<compile_context>
chip_gen: v7x
topology: tpu7x:2x2x1
jax: 0.10.0
libtpu: 0.0.40
codegen_flags: <defaults>
</compile_context>

<pallas_src>
import functools
import math

import jax
import jax.numpy as jnp
from jax.experimental import pallas as pl
from jax.experimental.pallas import tpu as pltpu


_INV_SQRT2 = 1.0 / math.sqrt(2.0)


# ----------------------------------------------------------------------------
# Pallas kernel: fused  o = act(lhs @ rhs + bias)
#   lhs/rhs arrive as bf16 (MXU-native), accumulate + epilogue in f32.
# ----------------------------------------------------------------------------
def _gemm_bias_act_kernel(lhs_ref, rhs_ref, b_ref, o_ref, *, act):
    acc = jnp.dot(lhs_ref[...], rhs_ref[...],
                  preferred_element_type=jnp.float32)
    acc = acc + b_ref[...]          # (R,1) or (1,N) bias broadcast
    if act == "gelu":               # exact erf GELU == nn.GELU(approximate='none')
        acc = 0.5 * acc * (1.0 + jax.lax.erf(acc * jnp.float32(_INV_SQRT2)))
    elif act == "tanh":
        acc = jnp.tanh(acc)
    o_ref[...] = acc.astype(o_ref.dtype)


def _pick_lane_tile(n, target=512):
    if n <= target:
        return n
    for t in (target, 384, 256, 128):
        if n % t == 0:
            return t
    return n


def fused_gemm(lhs, rhs, bias2d, *, act):
    """act(lhs @ rhs + bias2d). lhs:(R,K) rhs:(K,N) bias2d:(R,1)|(1,N) -> (R,N) f32."""
    R, K = lhs.shape
    K2, N = rhs.shape
    assert K == K2, (K, K2)

    lhs = lhs.astype(jnp.bfloat16)          # bf16 operands for the MXU
    rhs = rhs.astype(jnp.bfloat16)
    bias2d = bias2d.astype(jnp.float32)

    TN = _pick_lane_tile(N)                  # divides N exactly -> no pad/slice
    if bias2d.shape == (1, N):
        b_spec = pl.BlockSpec((1, TN), lambda j: (0, j))
    else:
        assert bias2d.shape == (R, 1), bias2d.shape
        b_spec = pl.BlockSpec((R, 1), lambda j: (0, 0))

    return pl.pallas_call(
        functools.partial(_gemm_bias_act_kernel, act=act),
        out_shape=jax.ShapeDtypeStruct((R, N), jnp.float32),
        grid=(N // TN,),
        in_specs=[
            pl.BlockSpec((R, K), lambda j: (0, 0)),    # weights stay VMEM-resident
            pl.BlockSpec((K, TN), lambda j: (0, j)),   # lane-tiled activations
            b_spec,
        ],
        out_specs=pl.BlockSpec((R, TN), lambda j: (0, j)),   # lane-dense output
        compiler_params=pltpu.CompilerParams(
            dimension_semantics=("parallel",)),
    )(lhs, rhs, bias2d)


# ----------------------------------------------------------------------------
# Conv layers lowered to the fused GEMM (transposed / lane-dense orientation).
# Internal activation layout is (C, B, H, W).
# ----------------------------------------------------------------------------
def _frame_conv3x3(frame, w_oihw, bias, *, act):
    """Stride-1 VALID 3x3 conv over a prebuilt frame via one fused Pallas GEMM.

    frame : (Cin, B, Hp, Wp)   already padded / zero-upsampled
    w_oihw: (Cout, Cin, 3, 3)
    returns (Cout, B, Hp-2, Wp-2)
    """
    Cin, B, Hp, Wp = frame.shape
    Cout = w_oihw.shape[0]
    Ho, Wo = Hp - 2, Wp - 2
    M = B * Ho * Wo
    taps = []
    for a in range(3):
        for c in range(3):
            taps.append(frame[:, :, a:a + Ho, c:c + Wo].reshape(Cin, M))
    col = jnp.concatenate(taps, axis=0)                     # (9*Cin, M), k=(a*3+c)*Cin+ci
    wm = jnp.transpose(w_oihw, (0, 2, 3, 1)).reshape(Cout, 9 * Cin)
    y = fused_gemm(wm, col, bias.reshape(Cout, 1), act=act)  # (Cout, M), M on lanes
    return y.reshape(Cout, B, Ho, Wo)


def conv2d_3x3_p1(x_cbhw, w_oihw, bias, *, act):
    """nn.Conv2d(kernel_size=3, padding=1) + activation."""
    frame = jnp.pad(x_cbhw, ((0, 0), (0, 0), (1, 1), (1, 1)))
    return _frame_conv3x3(frame, w_oihw, bias, act=act)


def conv_transpose2d_3x3_s2(x_cbhw, w_iohw, bias, *, act):
    """nn.ConvTranspose2d(k=3, stride=2, padding=1, output_padding=1) + activation.

    Rewritten as stride-1 VALID conv over the zero-upsampled (2H+2, 2W+2) frame
    (input values at odd positions) with the flipped, channel-swapped kernel.
    w_iohw is the PyTorch ConvTranspose layout (Cin, Cout, 3, 3).
    """
    Cin, B, H, W = x_cbhw.shape
    frame = jnp.zeros((Cin, B, 2 * H + 2, 2 * W + 2), x_cbhw.dtype)
    frame = frame.at[:, :, 1:2 * H:2, 1:2 * W:2].set(x_cbhw)
    w_conv = jnp.transpose(w_iohw, (1, 0, 2, 3))[:, :, ::-1, ::-1]  # (Cout, Cin, 3, 3)
    return _frame_conv3x3(frame, w_conv, bias, act=act)


# ----------------------------------------------------------------------------
# Parameters (deterministic, synthetic; PyTorch layouts & init-style bounds).
# ----------------------------------------------------------------------------
def init_decoder_params(key, num_input_channels, c_hid, latent_dim):
    def u(k, shape, bound):
        return jax.random.uniform(k, shape, jnp.float32, -bound, bound)

    ks = jax.random.split(key, 12)
    p = {}
    in_f, out_f = latent_dim, 2 * 16 * c_hid
    lb = 1.0 / math.sqrt(in_f)
    p["lin_w"] = u(ks[0], (out_f, in_f), lb)       # nn.Linear weight layout (out, in)
    p["lin_b"] = u(ks[1], (out_f,), lb)

    def convt(kw, kb, cin, cout):
        bound = 1.0 / math.sqrt(cout * 9)          # PyTorch fan_in for ConvT = Cout*k*k
        return u(kw, (cin, cout, 3, 3), bound), u(kb, (cout,), bound)

    def conv(kw, kb, cin, cout):
        bound = 1.0 / math.sqrt(cin * 9)
        return u(kw, (cout, cin, 3, 3), bound), u(kb, (cout,), bound)

    p["ct1_w"], p["ct1_b"] = convt(ks[2], ks[3], 2 * c_hid, 2 * c_hid)
    p["c1_w"], p["c1_b"] = conv(ks[4], ks[5], 2 * c_hid, 2 * c_hid)
    p["ct2_w"], p["ct2_b"] = convt(ks[6], ks[7], 2 * c_hid, c_hid)
    p["c2_w"], p["c2_b"] = conv(ks[8], ks[9], c_hid, c_hid)
    p["ct3_w"], p["ct3_b"] = convt(ks[10], ks[11], c_hid, num_input_channels)
    return p


# ----------------------------------------------------------------------------
# Forward pass (mirrors Decoder.forward).
# ----------------------------------------------------------------------------
def decoder_forward(z, params, *, c_hid):
    B = z.shape[0]
    # self.linear: Linear(latent, 2*16*c_hid) + GELU   (256 output lanes: dense)
    h = fused_gemm(z, params["lin_w"].T, params["lin_b"].reshape(1, -1), act="gelu")
    x = h.reshape(B, 2 * c_hid, 4, 4)                 # x.reshape(B, -1, 4, 4) (NCHW)
    x = jnp.transpose(x, (1, 0, 2, 3))                # internal (C, B, H, W) layout
    x = conv_transpose2d_3x3_s2(x, params["ct1_w"], params["ct1_b"], act="gelu")  # 4 -> 8
    x = conv2d_3x3_p1(x, params["c1_w"], params["c1_b"], act="gelu")              # 8
    x = conv_transpose2d_3x3_s2(x, params["ct2_w"], params["ct2_b"], act="gelu")  # 8 -> 16
    x = conv2d_3x3_p1(x, params["c2_w"], params["c2_b"], act="gelu")              # 16
    x = conv_transpose2d_3x3_s2(x, params["ct3_w"], params["ct3_b"], act="tanh")  # 16 -> 32
    return jnp.transpose(x, (1, 0, 2, 3))             # (B, C, 32, 32) NCHW


if __name__ == "__main__":
    num_input_channels = 3
    base_channel_size = 8     # c_hid (small demo size)
    latent_dim = 64
    batch = 2

    key = jax.random.PRNGKey(0)
    k_z, k_p = jax.random.split(key)
    z = jax.random.normal(k_z, (batch, latent_dim), jnp.float32)
    params = init_decoder_params(k_p, num_input_channels, base_channel_size,
                                 latent_dim)

    fwd = jax.jit(functools.partial(decoder_forward, c_hid=base_channel_size))
    out = fwd(z, params)
    out = jax.block_until_ready(out)

    assert out.shape == (batch, num_input_channels, 32, 32), out.shape
    assert out.dtype == jnp.float32
    assert bool(jnp.all(jnp.isfinite(out)))
    assert bool(jnp.all(jnp.abs(out) <= 1.0 + 1e-6))   # final Tanh range
    print("KERNEL_OK")
</pallas_src>

<mosaic_0001>
module attributes {stable_mosaic.version = 11 : i64} {
  func.func @_gemm_bias_act_kernel(%arg0: i32, %arg1: memref<2x64xbf16, #tpu.memory_space<vmem>>, %arg2: memref<64x256xbf16, #tpu.memory_space<vmem>>, %arg3: memref<1x256xf32, #tpu.memory_space<vmem>>, %arg4: memref<2x256xf32, #tpu.memory_space<vmem>>) attributes {dimension_semantics = [#tpu.dimension_semantics<parallel>], iteration_bounds = array<i64: 1>, scalar_prefetch = 0 : i64, scratch_operands = 0 : i64, tpu.core_type = #tpu.core_type<tc>, window_params = [{pipeline_mode = #tpu.pipeline_mode<synchronous>, transform_indices = @transform_0, window_bounds = array<i64: 2, 64>}, {transform_indices = @transform_1, window_bounds = array<i64: 64, 256>}, {transform_indices = @transform_2, window_bounds = array<i64: 1, 256>}, {transform_indices = @transform_3, window_bounds = array<i64: 2, 256>}]} {
    %c0 = arith.constant 0 : index
    %c0_0 = arith.constant 0 : index
    %0 = vector.load %arg1[%c0, %c0_0] : memref<2x64xbf16, #tpu.memory_space<vmem>>, vector<2x64xbf16>
    %c0_1 = arith.constant 0 : index
    %c0_2 = arith.constant 0 : index
    %1 = vector.load %arg2[%c0_1, %c0_2] : memref<64x256xbf16, #tpu.memory_space<vmem>>, vector<64x256xbf16>
    %cst = arith.constant dense<0.000000e+00> : vector<2x256xf32>
    %2 = tpu.matmul %0, %1, %cst {dimension_numbers = #tpu.dot_dimension_numbers<[1], [0], [0], [1], [0, 0, 1, 1], [], []>} : vector<2x64xbf16>, vector<64x256xbf16>, vector<2x256xf32> -> vector<2x256xf32>
    %c0_3 = arith.constant 0 : index
    %c0_4 = arith.constant 0 : index
    %3 = vector.load %arg3[%c0_3, %c0_4] : memref<1x256xf32, #tpu.memory_space<vmem>>, vector<1x256xf32>
    %4 = vector.broadcast %3 : vector<1x256xf32> to vector<2x256xf32>
    %5 = arith.addf %2, %4 : vector<2x256xf32>
    %cst_5 = arith.constant 5.000000e-01 : f32
    %6 = vector.broadcast %cst_5 : f32 to vector<2x256xf32>
    %7 = arith.mulf %6, %5 : vector<2x256xf32>
    %cst_6 = arith.constant 0.707106769 : f32
    %8 = vector.broadcast %cst_6 : f32 to vector<2x256xf32>
    %9 = arith.mulf %5, %8 : vector<2x256xf32>
    %10 = math.erf %9 : vector<2x256xf32>
    %cst_7 = arith.constant 1.000000e+00 : f32
    %11 = vector.broadcast %cst_7 : f32 to vector<2x256xf32>
    %12 = arith.addf %11, %10 : vector<2x256xf32>
    %13 = arith.mulf %7, %12 : vector<2x256xf32>
    %c0_8 = arith.constant 0 : index
    %c0_9 = arith.constant 0 : index
    %14 = vector.load %arg4[%c0_8, %c0_9] : memref<2x256xf32, #tpu.memory_space<vmem>>, vector<2x256xf32>
    tpu.vector_store %arg4[%c0_8, %c0_9], %13 {strides = array<i32>} : memref<2x256xf32, #tpu.memory_space<vmem>>, vector<2x256xf32>,
    return
  }
  func.func @transform_0(%arg0: i32) -> (i32, i32) {
    %c0_i32 = arith.constant 0 : i32
    %c0_i32_0 = arith.constant 0 : i32
    %c0_i32_1 = arith.constant 0 : i32
    return %c0_i32, %c0_i32_0 : i32, i32
  }
  func.func @transform_1(%arg0: i32) -> (i32, i32) {
    %c0_i32 = arith.constant 0 : i32
    %c0_i32_0 = arith.constant 0 : i32
    return %c0_i32, %arg0 : i32, i32
  }
  func.func @transform_2(%arg0: i32) -> (i32, i32) {
    %c0_i32 = arith.constant 0 : i32
    %c0_i32_0 = arith.constant 0 : i32
    return %c0_i32, %arg0 : i32, i32
  }
  func.func @transform_3(%arg0: i32) -> (i32, i32) {
    %c0_i32 = arith.constant 0 : i32
    %c0_i32_0 = arith.constant 0 : i32
    return %c0_i32, %arg0 : i32, i32
  }
}

module attributes {stable_mosaic.version = 11 : i64} {
  func.func @_gemm_bias_act_kernel(%arg0: i32, %arg1: memref<16x144xbf16, #tpu.memory_space<vmem>>, %arg2: memref<144x128xbf16, #tpu.memory_space<vmem>>, %arg3: memref<16x1xf32, #tpu.memory_space<vmem>>, %arg4: memref<16x128xf32, #tpu.memory_space<vmem>>) attributes {dimension_semantics = [#tpu.dimension_semantics<parallel>], iteration_bounds = array<i64: 1>, scalar_prefetch = 0 : i64, scratch_operands = 0 : i64, tpu.core_type = #tpu.core_type<tc>, window_params = [{pipeline_mode = #tpu.pipeline_mode<synchronous>, transform_indices = @transform_0, window_bounds = array<i64: 16, 144>}, {transform_indices = @transform_1, window_bounds = array<i64: 144, 128>}, {pipeline_mode = #tpu.pipeline_mode<synchronous>, transform_indices = @transform_2, window_bounds = array<i64: 16, 1>}, {transform_indices = @transform_3, window_bounds = array<i64: 16, 128>}]} {
    %c0 = arith.constant 0 : index
    %c0_0 = arith.constant 0 : index
    %0 = vector.load %arg1[%c0, %c0_0] : memref<16x144xbf16, #tpu.memory_space<vmem>>, vector<16x144xbf16>
    %c0_1 = arith.constant 0 : index
    %c0_2 = arith.constant 0 : index
    %1 = vector.load %arg2[%c0_1, %c0_2] : memref<144x128xbf16, #tpu.memory_space<vmem>>, vector<144x128xbf16>
    %cst = arith.constant dense<0.000000e+00> : vector<16x128xf32>
    %2 = tpu.matmul %0, %1, %cst {dimension_numbers = #tpu.dot_dimension_numbers<[1], [0], [0], [1], [0, 0, 1, 1], [], []>} : vector<16x144xbf16>, vector<144x128xbf16>, vector<16x128xf32> -> vector<16x128xf32>
    %c0_3 = arith.constant 0 : index
    %c0_4 = arith.constant 0 : index
    %3 = vector.load %arg3[%c0_3, %c0_4] : memref<16x1xf32, #tpu.memory_space<vmem>>, vector<16x1xf32>
    %4 = vector.broadcast %3 : vector<16x1xf32> to vector<16x128xf32>
    %5 = arith.addf %2, %4 : vector<16x128xf32>
    %cst_5 = arith.constant 5.000000e-01 : f32
    %6 = vector.broadcast %cst_5 : f32 to vector<16x128xf32>
    %7 = arith.mulf %6, %5 : vector<16x128xf32>
    %cst_6 = arith.constant 0.707106769 : f32
    %8 = vector.broadcast %cst_6 : f32 to vector<16x128xf32>
    %9 = arith.mulf %5, %8 : vector<16x128xf32>
    %10 = math.erf %9 : vector<16x128xf32>
    %cst_7 = arith.constant 1.000000e+00 : f32
    %11 = vector.broadcast %cst_7 : f32 to vector<16x128xf32>
    %12 = arith.addf %11, %10 : vector<16x128xf32>
    %13 = arith.mulf %7, %12 : vector<16x128xf32>
    %c0_8 = arith.constant 0 : index
    %c0_9 = arith.constant 0 : index
    %14 = vector.load %arg4[%c0_8, %c0_9] : memref<16x128xf32, #tpu.memory_space<vmem>>, vector<16x128xf32>
    tpu.vector_store %arg4[%c0_8, %c0_9], %13 {strides = array<i32>} : memref<16x128xf32, #tpu.memory_space<vmem>>, vector<16x128xf32>,
    return
  }
  func.func @transform_0(%arg0: i32) -> (i32, i32) {
    %c0_i32 = arith.constant 0 : i32
    %c0_i32_0 = arith.constant 0 : i32
    %c0_i32_1 = arith.constant 0 : i32
    return %c0_i32, %c0_i32_0 : i32, i32
  }
  func.func @transform_1(%arg0: i32) -> (i32, i32) {
    %c0_i32 = arith.constant 0 : i32
    %c0_i32_0 = arith.constant 0 : i32
    return %c0_i32, %arg0 : i32, i32
  }
  func.func @transform_2(%arg0: i32) -> (i32, i32) {
    %c0_i32 = arith.constant 0 : i32
    %c0_i32_0 = arith.constant 0 : i32
    %c0_i32_1 = arith.constant 0 : i32
    return %c0_i32, %c0_i32_0 : i32, i32
  }
  func.func @transform_3(%arg0: i32) -> (i32, i32) {
    %c0_i32 = arith.constant 0 : i32
    %c0_i32_0 = arith.constant 0 : i32
    return %c0_i32, %arg0 : i32, i32
  }
}

module attributes {stable_mosaic.version = 11 : i64} {
  func.func @_gemm_bias_act_kernel(%arg0: i32, %arg1: memref<8x144xbf16, #tpu.memory_space<vmem>>, %arg2: memref<144x512xbf16, #tpu.memory_space<vmem>>, %arg3: memref<8x1xf32, #tpu.memory_space<vmem>>, %arg4: memref<8x512xf32, #tpu.memory_space<vmem>>) attributes {dimension_semantics = [#tpu.dimension_semantics<parallel>], iteration_bounds = array<i64: 1>, scalar_prefetch = 0 : i64, scratch_operands = 0 : i64, tpu.core_type = #tpu.core_type<tc>, window_params = [{pipeline_mode = #tpu.pipeline_mode<synchronous>, transform_indices = @transform_0, window_bounds = array<i64: 8, 144>}, {transform_indices = @transform_1, window_bounds = array<i64: 144, 512>}, {pipeline_mode = #tpu.pipeline_mode<synchronous>, transform_indices = @transform_2, window_bounds = array<i64: 8, 1>}, {transform_indices = @transform_3, window_bounds = array<i64: 8, 512>}]} {
    %c0 = arith.constant 0 : index
    %c0_0 = arith.constant 0 : index
    %0 = vector.load %arg1[%c0, %c0_0] : memref<8x144xbf16, #tpu.memory_space<vmem>>, vector<8x144xbf16>
    %c0_1 = arith.constant 0 : index
    %c0_2 = arith.constant 0 : index
    %1 = vector.load %arg2[%c0_1, %c0_2] : memref<144x512xbf16, #tpu.memory_space<vmem>>, vector<144x512xbf16>
    %cst = arith.constant dense<0.000000e+00> : vector<8x512xf32>
    %2 = tpu.matmul %0, %1, %cst {dimension_numbers = #tpu.dot_dimension_numbers<[1], [0], [0], [1], [0, 0, 1, 1], [], []>} : vector<8x144xbf16>, vector<144x512xbf16>, vector<8x512xf32> -> vector<8x512xf32>
    %c0_3 = arith.constant 0 : index
    %c0_4 = arith.constant 0 : index
    %3 = vector.load %arg3[%c0_3, %c0_4] : memref<8x1xf32, #tpu.memory_space<vmem>>, vector<8x1xf32>
    %4 = vector.broadcast %3 : vector<8x1xf32> to vector<8x512xf32>
    %5 = arith.addf %2, %4 : vector<8x512xf32>
    %cst_5 = arith.constant 5.000000e-01 : f32
    %6 = vector.broadcast %cst_5 : f32 to vector<8x512xf32>
    %7 = arith.mulf %6, %5 : vector<8x512xf32>
    %cst_6 = arith.constant 0.707106769 : f32
    %8 = vector.broadcast %cst_6 : f32 to vector<8x512xf32>
    %9 = arith.mulf %5, %8 : vector<8x512xf32>
    %10 = math.erf %9 : vector<8x512xf32>
    %cst_7 = arith.constant 1.000000e+00 : f32
    %11 = vector.broadcast %cst_7 : f32 to vector<8x512xf32>
    %12 = arith.addf %11, %10 : vector<8x512xf32>
    %13 = arith.mulf %7, %12 : vector<8x512xf32>
    %c0_8 = arith.constant 0 : index
    %c0_9 = arith.constant 0 : index
    %14 = vector.load %arg4[%c0_8, %c0_9] : memref<8x512xf32, #tpu.memory_space<vmem>>, vector<8x512xf32>
    tpu.vector_store %arg4[%c0_8, %c0_9], %13 {strides = array<i32>} : memref<8x512xf32, #tpu.memory_space<vmem>>, vector<8x512xf32>,
    return
  }
  func.func @transform_0(%arg0: i32) -> (i32, i32) {
    %c0_i32 = arith.constant 0 : i32
    %c0_i32_0 = arith.constant 0 : i32
    %c0_i32_1 = arith.constant 0 : i32
    return %c0_i32, %c0_i32_0 : i32, i32
  }
  func.func @transform_1(%arg0: i32) -> (i32, i32) {
    %c0_i32 = arith.constant 0 : i32
    %c0_i32_0 = arith.constant 0 : i32
    return %c0_i32, %arg0 : i32, i32
  }
  func.func @transform_2(%arg0: i32) -> (i32, i32) {
    %c0_i32 = arith.constant 0 : i32
    %c0_i32_0 = arith.constant 0 : i32
    %c0_i32_1 = arith.constant 0 : i32
    return %c0_i32, %c0_i32_0 : i32, i32
  }
  func.func @transform_3(%arg0: i32) -> (i32, i32) {
    %c0_i32 = arith.constant 0 : i32
    %c0_i32_0 = arith.constant 0 : i32
    return %c0_i32, %arg0 : i32, i32
  }
}

module attributes {stable_mosaic.version = 11 : i64} {
  func.func @_gemm_bias_act_kernel(%arg0: i32, %arg1: memref<8x72xbf16, #tpu.memory_space<vmem>>, %arg2: memref<72x512xbf16, #tpu.memory_space<vmem>>, %arg3: memref<8x1xf32, #tpu.memory_space<vmem>>, %arg4: memref<8x512xf32, #tpu.memory_space<vmem>>) attributes {dimension_semantics = [#tpu.dimension_semantics<parallel>], iteration_bounds = array<i64: 1>, scalar_prefetch = 0 : i64, scratch_operands = 0 : i64, tpu.core_type = #tpu.core_type<tc>, window_params = [{pipeline_mode = #tpu.pipeline_mode<synchronous>, transform_indices = @transform_0, window_bounds = array<i64: 8, 72>}, {transform_indices = @transform_1, window_bounds = array<i64: 72, 512>}, {pipeline_mode = #tpu.pipeline_mode<synchronous>, transform_indices = @transform_2, window_bounds = array<i64: 8, 1>}, {transform_indices = @transform_3, window_bounds = array<i64: 8, 512>}]} {
    %c0 = arith.constant 0 : index
    %c0_0 = arith.constant 0 : index
    %0 = vector.load %arg1[%c0, %c0_0] : memref<8x72xbf16, #tpu.memory_space<vmem>>, vector<8x72xbf16>
    %c0_1 = arith.constant 0 : index
    %c0_2 = arith.constant 0 : index
    %1 = vector.load %arg2[%c0_1, %c0_2] : memref<72x512xbf16, #tpu.memory_space<vmem>>, vector<72x512xbf16>
    %cst = arith.constant dense<0.000000e+00> : vector<8x512xf32>
    %2 = tpu.matmul %0, %1, %cst {dimension_numbers = #tpu.dot_dimension_numbers<[1], [0], [0], [1], [0, 0, 1, 1], [], []>} : vector<8x72xbf16>, vector<72x512xbf16>, vector<8x512xf32> -> vector<8x512xf32>
    %c0_3 = arith.constant 0 : index
    %c0_4 = arith.constant 0 : index
    %3 = vector.load %arg3[%c0_3, %c0_4] : memref<8x1xf32, #tpu.memory_space<vmem>>, vector<8x1xf32>
    %4 = vector.broadcast %3 : vector<8x1xf32> to vector<8x512xf32>
    %5 = arith.addf %2, %4 : vector<8x512xf32>
    %cst_5 = arith.constant 5.000000e-01 : f32
    %6 = vector.broadcast %cst_5 : f32 to vector<8x512xf32>
    %7 = arith.mulf %6, %5 : vector<8x512xf32>
    %cst_6 = arith.constant 0.707106769 : f32
    %8 = vector.broadcast %cst_6 : f32 to vector<8x512xf32>
    %9 = arith.mulf %5, %8 : vector<8x512xf32>
    %10 = math.erf %9 : vector<8x512xf32>
    %cst_7 = arith.constant 1.000000e+00 : f32
    %11 = vector.broadcast %cst_7 : f32 to vector<8x512xf32>
    %12 = arith.addf %11, %10 : vector<8x512xf32>
    %13 = arith.mulf %7, %12 : vector<8x512xf32>
    %c0_8 = arith.constant 0 : index
    %c0_9 = arith.constant 0 : index
    %14 = vector.load %arg4[%c0_8, %c0_9] : memref<8x512xf32, #tpu.memory_space<vmem>>, vector<8x512xf32>
    tpu.vector_store %arg4[%c0_8, %c0_9], %13 {strides = array<i32>} : memref<8x512xf32, #tpu.memory_space<vmem>>, vector<8x512xf32>,
    return
  }
  func.func @transform_0(%arg0: i32) -> (i32, i32) {
    %c0_i32 = arith.constant 0 : i32
    %c0_i32_0 = arith.constant 0 : i32
    %c0_i32_1 = arith.constant 0 : i32
    return %c0_i32, %c0_i32_0 : i32, i32
  }
  func.func @transform_1(%arg0: i32) -> (i32, i32) {
    %c0_i32 = arith.constant 0 : i32
    %c0_i32_0 = arith.constant 0 : i32
    return %c0_i32, %arg0 : i32, i32
  }
  func.func @transform_2(%arg0: i32) -> (i32, i32) {
    %c0_i32 = arith.constant 0 : i32
    %c0_i32_0 = arith.constant 0 : i32
    %c0_i32_1 = arith.constant 0 : i32
    return %c0_i32, %c0_i32_0 : i32, i32
  }
  func.func @transform_3(%arg0: i32) -> (i32, i32) {
    %c0_i32 = arith.constant 0 : i32
    %c0_i32_0 = arith.constant 0 : i32
    return %c0_i32, %arg0 : i32, i32
  }
}

module attributes {stable_mosaic.version = 11 : i64} {
  func.func @_gemm_bias_act_kernel(%arg0: i32, %arg1: memref<3x72xbf16, #tpu.memory_space<vmem>>, %arg2: memref<72x512xbf16, #tpu.memory_space<vmem>>, %arg3: memref<3x1xf32, #tpu.memory_space<vmem>>, %arg4: memref<3x512xf32, #tpu.memory_space<vmem>>) attributes {dimension_semantics = [#tpu.dimension_semantics<parallel>], iteration_bounds = array<i64: 4>, scalar_prefetch = 0 : i64, scratch_operands = 0 : i64, tpu.core_type = #tpu.core_type<tc>, window_params = [{pipeline_mode = #tpu.pipeline_mode<synchronous>, transform_indices = @transform_0, window_bounds = array<i64: 3, 72>}, {transform_indices = @transform_1, window_bounds = array<i64: 72, 512>}, {pipeline_mode = #tpu.pipeline_mode<synchronous>, transform_indices = @transform_2, window_bounds = array<i64: 3, 1>}, {transform_indices = @transform_3, window_bounds = array<i64: 3, 512>}]} {
    %c0 = arith.constant 0 : index
    %c0_0 = arith.constant 0 : index
    %0 = vector.load %arg1[%c0, %c0_0] : memref<3x72xbf16, #tpu.memory_space<vmem>>, vector<3x72xbf16>
    %c0_1 = arith.constant 0 : index
    %c0_2 = arith.constant 0 : index
    %1 = vector.load %arg2[%c0_1, %c0_2] : memref<72x512xbf16, #tpu.memory_space<vmem>>, vector<72x512xbf16>
    %cst = arith.constant dense<0.000000e+00> : vector<3x512xf32>
    %2 = tpu.matmul %0, %1, %cst {dimension_numbers = #tpu.dot_dimension_numbers<[1], [0], [0], [1], [0, 0, 1, 1], [], []>} : vector<3x72xbf16>, vector<72x512xbf16>, vector<3x512xf32> -> vector<3x512xf32>
    %c0_3 = arith.constant 0 : index
    %c0_4 = arith.constant 0 : index
    %3 = vector.load %arg3[%c0_3, %c0_4] : memref<3x1xf32, #tpu.memory_space<vmem>>, vector<3x1xf32>
    %4 = vector.broadcast %3 : vector<3x1xf32> to vector<3x512xf32>
    %5 = arith.addf %2, %4 : vector<3x512xf32>
    %6 = math.tanh %5 : vector<3x512xf32>
    %c0_5 = arith.constant 0 : index
    %c0_6 = arith.constant 0 : index
    %7 = vector.load %arg4[%c0_5, %c0_6] : memref<3x512xf32, #tpu.memory_space<vmem>>, vector<3x512xf32>
    tpu.vector_store %arg4[%c0_5, %c0_6], %6 {strides = array<i32>} : memref<3x512xf32, #tpu.memory_space<vmem>>, vector<3x512xf32>,
    return
  }
  func.func @transform_0(%arg0: i32) -> (i32, i32) {
    %c0_i32 = arith.constant 0 : i32
    %c0_i32_0 = arith.constant 0 : i32
    %c0_i32_1 = arith.constant 0 : i32
    return %c0_i32, %c0_i32_0 : i32, i32
  }
  func.func @transform_1(%arg0: i32) -> (i32, i32) {
    %c0_i32 = arith.constant 0 : i32
    %c0_i32_0 = arith.constant 0 : i32
    return %c0_i32, %arg0 : i32, i32
  }
  func.func @transform_2(%arg0: i32) -> (i32, i32) {
    %c0_i32 = arith.constant 0 : i32
    %c0_i32_0 = arith.constant 0 : i32
    %c0_i32_1 = arith.constant 0 : i32
    return %c0_i32, %c0_i32_0 : i32, i32
  }
  func.func @transform_3(%arg0: i32) -> (i32, i32) {
    %c0_i32 = arith.constant 0 : i32
    %c0_i32_0 = arith.constant 0 : i32
    return %c0_i32, %arg0 : i32, i32
  }
}

</mosaic_0001>

<bundles_post_ra>
// kernel: decoder_forward.6
= control target key start
LH: loop header
LB: loop body
LE: loop exit
PB: predicated region body
PF: predicated region fallthrough
CT: control target
= control target key end

     0   :  { %8 = vsyncpa [#allocation3], 0  ;;  %s212_s12 = smov [#allocation2]   ;;  %s276_s0 = inlined_call_operand.vmem [shape: bf16[2,64], index: 0, kind: input, shape index: {}]   ;;  %s277_s1 = inlined_call_operand.vmem [shape: bf16[64,256], index: 1, kind: input, shape index: {}]   ;;  %s278_s2 = inlined_call_operand.hbm [shape: f32[1,256], index: 2, kind: input, shape index: {}]   ;;  %s279_s3 = inlined_call_operand.vmem [shape: f32[2,256], index: 3, kind: output, shape index: {}]  }
   0x1   :  { %s19_s13 = sshll.u32 %s212_s12, 4  ;;  %s188_s16 = scalar_lea.hbm %s278_s2, 32  ;;  %s20_s13 = int_to_ptr.vmem [resolvable:$true] %s19_s13 }
   0x2   :  { %p189_p0 = scmp.ne.s32.totalorder %s278_s2, %s188_s16  ;;  %p192_p1 = scmp.lt.u32.totalorder %s188_s16, %s278_s2 }
   0x4   :  { %p194_p2 = pnand %p192_p1, %p189_p0 }
   0x6   :  { %197 = shalt.err (!%p194_p2)
}
   0x7   :  { %s198_s21 = scalar_lea.vmem %s20_s13, 32  ;;  %p203_p4 = scmp.lt.s32.totalorder %s20_s13, %s20_s13 }
   0x8   :  { %p199_p3 = scmp.ne.s32.totalorder %s20_s13, %s198_s21  ;;  %p204_p5 = scmp.lt.s32.totalorder %s198_s21, %s198_s21 }
   0xa   :  { %p205_p6 = por %p204_p5, %p203_p4 }
   0xc   :  { %p206_p7 = pnand %p205_p6, %p199_p3 }
   0xe   :  { %209 = shalt.err (!%p206_p7)
}
   0xf   :  { %22 = dma.hbm_to_vmem [thread:$0]  %s278_s2, 32, %s20_s13, [#allocation3]  }
  0x10   :  { %210 = dma.done.wait [#allocation3], 32  }
  0x11   :  { %211 = vsyncadd [#allocation3], 4294967264  ;;  %v213_v0 = vmov 0   ;;  %v172_v1 = vld [vmem:[%s277_s1 + $0x4] ss:$8 sps:$4 sm:$0xff]   ;;  %vm88_vm0 = vcmask 523264   ;;  %v38_v10 = vlaneseq }
  0x12   :  { %124 = vmatprep.mubr.bf16.mxu0 %v213_v0  ;;  %v174_v2 = vld [vmem:[%s277_s1] ss:$8 sps:$4 sm:$0xff]   ;;  %92 = vmatprep.subr.bf16.mxu0 %v172_v1  ;;  %v175_v3 = vld [vmem:[%s277_s1 + $0x14] ss:$8 sps:$4 sm:$0xff]   ;;  %v177_v4 = vld [vmem:[%s277_s1 + $0x10] ss:$8 sps:$4 sm:$0xff]  }
  0x13   :  { %93 = vmatpush1.bf16.msra.mxu0 %v174_v2  ;;  %v178_v5 = vld [vmem:[%s277_s1 + $0x24] ss:$8 sps:$4 sm:$0xff]   ;;  %v180_v6 = vld [vmem:[%s277_s1 + $0x20] ss:$8 sps:$4 sm:$0xff]   ;;  %v181_v7 = vld [vmem:[%s277_s1 + $0x34] ss:$8 sps:$4 sm:$0xff]  }
  0x14   :  { %94 = vmatprep.subr.bf16.mxu0 %v175_v3  ;;  %v183_v8 = vld [vmem:[%s277_s1 + $0x30] ss:$8 sps:$4 sm:$0xff]   ;;  %v27_v9 = vld [vmem:[%s276_s0] sm:$0x1]  ;;  %v39_v11 = vshrl.u32 %v38_v10, 7 }
  0x15   :  { %v36_v13 = vld [vmem:[#allocation2] sm:$0x3] }
  0x16   :  { %v40_v12 = vsub.s32 0, %v39_v11  ;;  %v44_v14 = vsub.s32 1, %v39_v11 }
  0x17   :  { %95 = vmatpush1.bf16.msra.mxu0 %v177_v4 }
  0x18   :  { %96 = vmatprep.subr.bf16.mxu0 %v178_v5  ;;  %v41_v15 = vrot.slane %v36_v13, %v40_v12  ;;  %v45_v16 = vrot.slane %v36_v13, %v44_v14 }
  0x1b   :  { %97 = vmatpush1.bf16.msra.mxu0 %v180_v6 }
  0x1c   :  { %98 = vmatprep.subr.bf16.mxu0 %v181_v7 }
  0x1f   :  { %99 = vmatpush1.bf16.msra.mxu0 %v183_v8 }
  0x22   :  { %168 = vmatmul.mubr.msk.bf16.vlgmr.msra.gmra.mrb[0].mxu0 %vm88_vm0, %v27_v9 }
  0xf5   :  { %v126_v17 = vpop.f32.mrb[0].mxu0 }
  0xf6   :  { %v127_v18 = vadd.f32 %v126_v17, %v41_v15  ;;  %v128_v19 = vpop.f32.mrb[1].mxu0 }
  0xf7   :  { %v129_v20 = vadd.f32 %v128_v19, %v45_v16  ;;  %v130_v21 = vpop.f32.mrb[2].mxu0 }
  0xf8   :  { %v135_v22 = vmul.f32 0.70710677, %v127_v18  ;;  %v131_v23 = vpop.f32.mrb[3].mxu0  ;;  %v133_v27 = vmul.f32 0.5, %v127_v18 }
  0xf9   :  { %v136_v24 = vmul.f32 0.70710677, %v129_v20  ;;  %v134_v29 = vmul.f32 0.5, %v129_v20 }
  0xfa   :  { %184 = verf.f32 %v135_v22 }
  0xfb   :  { %186 = verf.f32 %v136_v24 }
 0x104   :  { %v185_v25 = vpop.eup %184 }
 0x105   :  { %v187_v26 = vpop.eup %186  ;;  %v139_v28 = vadd.f32 1.0, %v185_v25 }
 0x106   :  { %v140_v30 = vadd.f32 1.0, %v187_v26 }
 0x107   :  { %v141_v31 = vmul.f32 %v139_v28, %v133_v27 }
 0x108   :  { %v142_v32 = vmul.f32 %v140_v30, %v134_v29 }
 0x10a   :  { %v145_v33 = vcombine.low %v141_v31, %v142_v32 }
 0x10c   :  { %169 = vst.sshfl [vmem:[%s279_s3] sm:$0x33 pattern:$0x76325410] %v145_v33 }
 0x10d   :  { %159 = vsyncpa [#allocation3], 1 }

// kernel: decoder_forward.7
= control target key start
LH: loop header
LB: loop body
LE: loop exit
PB: predicated region body
PF: predicated region fallthrough
CT: control target
= control target key end

     0   :  { %v201_v0 = vmov 0   ;;  %vm110_vm0 = vcmask 130048   ;;  %s267_s1 = inlined_call_operand.vmem [shape: bf16[144,128], index: 1, kind: input, shape index: {}]   ;;  %s268_s0 = inlined_call_operand.vmem [shape: bf16[16,144], index: 0, kind: input, shape index: {}]   ;;  %s269_s2 = inlined_call_operand.vmem [shape: f32[16,1], index: 2, kind: input, shape index: {}]   ;;  %s270_s3 = inlined_call_operand.vmem [shape: f32[16,128], index: 3, kind: output, shape index: {}]  }
   0x1   :  { %114 = vmatprep.subr.bf16.mxu0 %v201_v0  ;;  %v185_v1 = vld [vmem:[%s267_s1] sm:$0xff]   ;;  %184 = vset.pattern.permute.xlu0 %v201_v0  ;;  %v186_v2 = vld [vmem:[%s267_s1 + $0x8] sm:$0xff]   ;;  %v187_v3 = vld [vmem:[%s267_s1 + $0x10] sm:$0xff]  }
   0x2   :  { %115 = vmatpush1.bf16.msra.mxu0 %v185_v1  ;;  %v188_v4 = vld [vmem:[%s267_s1 + $0x18] sm:$0xff]   ;;  %v196_v5 = vld [vmem:[%s268_s0 + $0x4] ss:$8 sps:$4 sm:$0xff]   ;;  %v191_v10 = vld [vmem:[%s267_s1 + $0x30] sm:$0xff]  }
   0x3   :  { %116 = vmatprep.subr.bf16.mxu0 %v201_v0  ;;  %v35_v6 = vld [vmem:[%s269_s2] sm:$0xff]  ;;  %182 = vmatprep.mubr.msk.bf16.mxu0 %vm110_vm0, %v196_v5  ;;  %v36_v7 = vld [vmem:[%s269_s2 + $0x8] sm:$0xff]  ;;  %v192_v11 = vld [vmem:[%s267_s1 + $0x38] sm:$0xff]  }
   0x4   :  { %39 = vperm.xlu0 %184, %v35_v6   ;;  %v189_v8 = vld [vmem:[%s267_s1 + $0x20] sm:$0xff]   ;;  %v190_v9 = vld [vmem:[%s267_s1 + $0x28] sm:$0xff]  }
   0x5   :  { %v193_v12 = vld [vmem:[%s267_s1 + $0x40] sm:$0xff]  }
   0x6   :  { %117 = vmatpush1.bf16.msra.mxu0 %v186_v2  ;;  %v194_v13 = vld [vmem:[%s268_s0] ss:$8 sps:$4 sm:$0xff]  }
   0x7   :  { %118 = vmatprep.subr.bf16.mxu0 %v201_v0 }
   0x8   :  { %44 = vperm.xlu0 %184, %v36_v7  }
   0xa   :  { %119 = vmatpush1.bf16.msra.mxu0 %v187_v3 }
   0xb   :  { %120 = vmatprep.subr.bf16.mxu0 %v201_v0 }
   0xe   :  { %121 = vmatpush1.bf16.msra.mxu0 %v188_v4 }
   0xf   :  { %122 = vmatprep.subr.bf16.mxu0 %v201_v0 }
  0x12   :  { %123 = vmatpush1.bf16.msra.mxu0 %v189_v8 }
  0x13   :  { %124 = vmatprep.subr.bf16.mxu0 %v201_v0 }
  0x16   :  { %125 = vmatpush1.bf16.msra.mxu0 %v190_v9 }
  0x17   :  { %126 = vmatprep.subr.bf16.mxu0 %v201_v0 }
  0x1a   :  { %127 = vmatpush1.bf16.msra.mxu0 %v191_v10 }
  0x1b   :  { %128 = vmatprep.subr.bf16.mxu0 %v201_v0 }
  0x1e   :  { %129 = vmatpush1.bf16.msra.mxu0 %v192_v11 }
  0x1f   :  { %130 = vmatprep.subr.bf16.mxu0 %v201_v0 }
  0x22   :  { %131 = vmatpush1.bf16.msra.mxu0 %v193_v12 }
  0x25   :  { %147 = vmatmul.mubr.bf16.vlgmr.msra.gmra.mrb[0].mxu0 %v194_v13 }
  0x83   :  { %v40_v14 = vpop.permute.xlu0 %39 }
  0x87   :  { %v45_v18 = vpop.permute.xlu0 %44 }
  0xf8   :  { %v148_v15 = vpop.f32.mrb[0].mxu0 }
  0xf9   :  { %v149_v16 = vadd.f32 %v148_v15, %v40_v14  ;;  %v150_v17 = vpop.f32.mrb[1].mxu0 }
  0xfa   :  { %v151_v19 = vpop.f32.mrb[2].mxu0 }
  0xfb   :  { %v157_v20 = vmul.f32 0.70710677, %v149_v16  ;;  %v152_v21 = vadd.f32 %v151_v19, %v45_v18  ;;  %v153_v22 = vpop.f32.mrb[3].mxu0  ;;  %v155_v25 = vmul.f32 0.5, %v149_v16 }
  0xfd   :  { %197 = verf.f32 %v157_v20  ;;  %v158_v23 = vmul.f32 0.70710677, %v152_v21  ;;  %v156_v29 = vmul.f32 0.5, %v152_v21 }
  0xff   :  { %199 = verf.f32 %v158_v23 }
 0x107   :  { %v198_v24 = vpop.eup %197 }
 0x108   :  { %v161_v26 = vadd.f32 1.0, %v198_v24 }
 0x109   :  { %v200_v27 = vpop.eup %199 }
 0x10a   :  { %v163_v28 = vmul.f32 %v161_v26, %v155_v25  ;;  %v162_v30 = vadd.f32 1.0, %v200_v27 }
 0x10c   :  { %165 = vst [vmem:[%s270_s3] sm:$0xff] %v163_v28  ;;  %v164_v31 = vmul.f32 %v162_v30, %v156_v29 }
 0x10e   :  { %166 = vst [vmem:[%s270_s3 + $0x8] sm:$0xff] %v164_v31 }

// kernel: decoder_forward.9
= control target key start
LH: loop header
LB: loop body
LE: loop exit
PB: predicated region body
PF: predicated region fallthrough
CT: control target
= control target key end

     0   :  { %v464_v1 = vmov 0   ;;  %vm244_vm0 = vcmask 130048   ;;  %s611_s1 = inlined_call_operand.vmem [shape: bf16[144,512], index: 1, kind: input, shape index: {}]   ;;  %s612_s0 = inlined_call_operand.vmem [shape: bf16[8,144], index: 0, kind: input, shape index: {}]   ;;  %s613_s2 = inlined_call_operand.vmem [shape: f32[8,1], index: 2, kind: input, shape index: {}]   ;;  %s614_s3 = inlined_call_operand.vmem [shape: f32[8,512], index: 3, kind: output, shape index: {}]  }
   0x1   :  { %v400_v0 = vld [vmem:[%s611_s1 + $0x4] ss:$16 sps:$4 sm:$0xff]   ;;  %399 = vset.pattern.permute.xlu0 %v464_v1  ;;  %v402_v2 = vld [vmem:[%s611_s1 + $0xc] ss:$16 sps:$4 sm:$0xff]   ;;  %v404_v3 = vld [vmem:[%s611_s1] ss:$16 sps:$4 sm:$0xff]  }
   0x2   :  { %248 = vmatprep.subr.bf16.mxu0 %v400_v0  ;;  %v405_v4 = vld [vmem:[%s611_s1 + $0x8] ss:$16 sps:$4 sm:$0xff]   ;;  %289 = vmatprep.subr.bf16.mxu1 %v402_v2  ;;  %v406_v5 = vld [vmem:[%s611_s1 + $0x24] ss:$16 sps:$4 sm:$0xff]   ;;  %v408_v6 = vld [vmem:[%s611_s1 + $0x2c] ss:$16 sps:$4 sm:$0xff]  }
   0x3   :  { %249 = vmatpush1.bf16.msra.mxu0 %v404_v3  ;;  %290 = vmatpush1.bf16.msra.mxu1 %v405_v4  ;;  %v410_v7 = vld [vmem:[%s611_s1 + $0x20] ss:$16 sps:$4 sm:$0xff]   ;;  %v411_v8 = vld [vmem:[%s611_s1 + $0x28] ss:$16 sps:$4 sm:$0xff]   ;;  %v412_v9 = vld [vmem:[%s611_s1 + $0x44] ss:$16 sps:$4 sm:$0xff]  }
   0x4   :  { %250 = vmatprep.subr.bf16.mxu0 %v406_v5  ;;  %291 = vmatprep.subr.bf16.mxu1 %v408_v6  ;;  %v414_v10 = vld [vmem:[%s611_s1 + $0x4c] ss:$16 sps:$4 sm:$0xff]   ;;  %v416_v11 = vld [vmem:[%s611_s1 + $0x40] ss:$16 sps:$4 sm:$0xff]   ;;  %v417_v12 = vld [vmem:[%s611_s1 + $0x48] ss:$16 sps:$4 sm:$0xff]  }
   0x5   :  { %v418_v13 = vld [vmem:[%s611_s1 + $0x64] ss:$16 sps:$4 sm:$0xff]   ;;  %v420_v14 = vld [vmem:[%s611_s1 + $0x6c] ss:$16 sps:$4 sm:$0xff]   ;;  %v422_v15 = vld [vmem:[%s611_s1 + $0x60] ss:$16 sps:$4 sm:$0xff]  }
   0x6   :  { %v423_v16 = vld [vmem:[%s611_s1 + $0x68] ss:$16 sps:$4 sm:$0xff]   ;;  %v424_v17 = vld [vmem:[%s611_s1 + $0x84] ss:$16 sps:$4 sm:$0xff]   ;;  %v426_v18 = vld [vmem:[%s611_s1 + $0x8c] ss:$16 sps:$4 sm:$0xff]  }
   0x7   :  { %251 = vmatpush1.bf16.msra.mxu0 %v410_v7  ;;  %292 = vmatpush1.bf16.msra.mxu1 %v411_v8  ;;  %v428_v19 = vld [vmem:[%s611_s1 + $0x80] ss:$16 sps:$4 sm:$0xff]   ;;  %v429_v20 = vld [vmem:[%s611_s1 + $0x88] ss:$16 sps:$4 sm:$0xff]   ;;  %v430_v21 = vld [vmem:[%s611_s1 + $0xa4] ss:$16 sps:$4 sm:$0xff]  }
   0x8   :  { %252 = vmatprep.subr.bf16.mxu0 %v412_v9  ;;  %293 = vmatprep.subr.bf16.mxu1 %v414_v10  ;;  %v432_v22 = vld [vmem:[%s611_s1 + $0xac] ss:$16 sps:$4 sm:$0xff]   ;;  %v434_v23 = vld [vmem:[%s611_s1 + $0xa0] ss:$16 sps:$4 sm:$0xff]   ;;  %v435_v24 = vld [vmem:[%s611_s1 + $0xa8] ss:$16 sps:$4 sm:$0xff]  }
   0x9   :  { %v436_v25 = vld [vmem:[%s611_s1 + $0xc4] ss:$16 sps:$4 sm:$0xff]   ;;  %v438_v26 = vld [vmem:[%s611_s1 + $0xcc] ss:$16 sps:$4 sm:$0xff]   ;;  %v440_v27 = vld [vmem:[%s611_s1 + $0xc0] ss:$16 sps:$4 sm:$0xff]  }
   0xa   :  { %v441_v28 = vld [vmem:[%s611_s1 + $0xc8] ss:$16 sps:$4 sm:$0xff]   ;;  %v15_v29 = vld [vmem:[%s612_s0] sm:$0xff]  ;;  %v444_v32 = vld [vmem:[%s611_s1 + $0xec] ss:$16 sps:$4 sm:$0xff]  }
   0xb   :  { %253 = vmatpush1.bf16.msra.mxu0 %v416_v11  ;;  %294 = vmatpush1.bf16.msra.mxu1 %v417_v12  ;;  %v52_v30 = vld [vmem:[%s613_s2] sm:$0xff]  ;;  %v359_v33 = vcombine.high %v15_v29, %v15_v29  ;;  %v447_v35 = vld [vmem:[%s611_s1 + $0xe8] ss:$16 sps:$4 sm:$0xff]   ;;  %v450_v37 = vld [vmem:[%s611_s1 + $0x10c] ss:$16 sps:$4 sm:$0xff]   ;;  %v358_v40 = vcombine.low %v15_v29, %v15_v29 }
   0xc   :  { %254 = vmatprep.subr.bf16.mxu0 %v418_v13  ;;  %295 = vmatprep.subr.bf16.mxu1 %v420_v14  ;;  %v442_v31 = vld [vmem:[%s611_s1 + $0xe4] ss:$16 sps:$4 sm:$0xff]   ;;  %v446_v34 = vld [vmem:[%s611_s1 + $0xe0] ss:$16 sps:$4 sm:$0xff]   ;;  %v453_v39 = vld [vmem:[%s611_s1 + $0x108] ss:$16 sps:$4 sm:$0xff]  }
   0xd   :  { %55 = vperm.xlu0 %399, %v52_v30   ;;  %396 = vmatprep.mubr.msk.bf16.mxu0 %vm244_vm0, %v359_v33  ;;  %v448_v36 = vld [vmem:[%s611_s1 + $0x104] ss:$16 sps:$4 sm:$0xff]   ;;  %v452_v38 = vld [vmem:[%s611_s1 + $0x100] ss:$16 sps:$4 sm:$0xff]  }
   0xe   :  { %397 = vmatprep.mubr.msk.bf16.mxu1 %vm244_vm0, %v359_v33 }
   0xf   :  { %255 = vmatpush1.bf16.msra.mxu0 %v422_v15  ;;  %296 = vmatpush1.bf16.msra.mxu1 %v423_v16 }
  0x10   :  { %256 = vmatprep.subr.bf16.mxu0 %v424_v17  ;;  %297 = vmatprep.subr.bf16.mxu1 %v426_v18 }
  0x13   :  { %257 = vmatpush1.bf16.msra.mxu0 %v428_v19  ;;  %298 = vmatpush1.bf16.msra.mxu1 %v429_v20 }
  0x14   :  { %258 = vmatprep.subr.bf16.mxu0 %v430_v21  ;;  %299 = vmatprep.subr.bf16.mxu1 %v432_v22 }
  0x17   :  { %259 = vmatpush1.bf16.msra.mxu0 %v434_v23  ;;  %300 = vmatpush1.bf16.msra.mxu1 %v435_v24 }
  0x18   :  { %260 = vmatprep.subr.bf16.mxu0 %v436_v25  ;;  %301 = vmatprep.subr.bf16.mxu1 %v438_v26 }
  0x1b   :  { %261 = vmatpush1.bf16.msra.mxu0 %v440_v27  ;;  %302 = vmatpush1.bf16.msra.mxu1 %v441_v28 }
  0x1c   :  { %262 = vmatprep.subr.bf16.mxu0 %v442_v31  ;;  %303 = vmatprep.subr.bf16.mxu1 %v444_v32 }
  0x1f   :  { %263 = vmatpush1.bf16.msra.mxu0 %v446_v34  ;;  %304 = vmatpush1.bf16.msra.mxu1 %v447_v35 }
  0x20   :  { %264 = vmatprep.subr.bf16.mxu0 %v448_v36  ;;  %305 = vmatprep.subr.bf16.mxu1 %v450_v37 }
  0x23   :  { %265 = vmatpush1.bf16.msra.mxu0 %v452_v38  ;;  %306 = vmatpush1.bf16.msra.mxu1 %v453_v39 }
  0x26   :  { %281 = vmatmul.mubr.bf16.vlgmr.msra.gmra.mrb[0].mxu0 %v358_v40  ;;  %322 = vmatmul.mubr.bf16.vlgmr.msra.gmra.mrb[0].mxu1 %v358_v40 }
  0x8c   :  { %v56_v41 = vpop.permute.xlu0 %55 }
  0xf9   :  { %v282_v42 = vpop.f32.mrb[0].mxu0  ;;  %v323_v43 = vpop.f32.mrb[0].mxu1 }
  0xfa   :  { %v283_v44 = vadd.f32 %v282_v42, %v56_v41  ;;  %v324_v45 = vadd.f32 %v323_v43, %v56_v41  ;;  %v284_v46 = vpop.f32.mrb[1].mxu0  ;;  %v325_v47 = vpop.f32.mrb[1].mxu1 }
  0xfb   :  { %v285_v48 = vadd.f32 %v284_v46, %v56_v41  ;;  %v326_v49 = vadd.f32 %v325_v47, %v56_v41  ;;  %v286_v50 = vpop.f32.mrb[2].mxu0  ;;  %v327_v51 = vpop.f32.mrb[2].mxu1 }
  0xfc   :  { %v334_v52 = vmul.f32 0.70710677, %v283_v44  ;;  %v336_v53 = vmul.f32 0.70710677, %v324_v45  ;;  %v287_v56 = vpop.f32.mrb[3].mxu0  ;;  %v328_v57 = vpop.f32.mrb[3].mxu1 }
  0xfd   :  { %v335_v54 = vmul.f32 0.70710677, %v285_v48  ;;  %v337_v55 = vmul.f32 0.70710677, %v326_v49  ;;  %v330_v60 = vmul.f32 0.5, %v283_v44  ;;  %v332_v63 = vmul.f32 0.5, %v324_v45 }
  0xfe   :  { %456 = verf.f32 %v334_v52  ;;  %v331_v3 = vmul.f32 0.5, %v285_v48  ;;  %v333_v6 = vmul.f32 0.5, %v326_v49 }
  0xff   :  { %458 = verf.f32 %v336_v53 }
 0x100   :  { %460 = verf.f32 %v335_v54 }
 0x101   :  { %462 = verf.f32 %v337_v55 }
 0x108   :  { %v457_v58 = vpop.eup %456 }
 0x109   :  { %v459_v59 = vpop.eup %458  ;;  %v342_v61 = vadd.f32 1.0, %v457_v58 }
 0x10a   :  { %v461_v62 = vpop.eup %460  ;;  %v344_v0 = vadd.f32 1.0, %v459_v59 }
 0x10b   :  { %v463_v1 = vpop.eup %462  ;;  %v346_v2 = vmul.f32 %v342_v61, %v330_v60  ;;  %v343_v4 = vadd.f32 1.0, %v461_v62 }
 0x10c   :  { %v348_v5 = vmul.f32 %v344_v0, %v332_v63  ;;  %v345_v7 = vadd.f32 1.0, %v463_v1 }
 0x10d   :  { %350 = vst [vmem:[%s614_s3] sm:$0xff] %v346_v2  ;;  %v347_v8 = vmul.f32 %v343_v4, %v331_v3 }
 0x10e   :  { %352 = vst [vmem:[%s614_s3 + $0x10] sm:$0xff] %v348_v5  ;;  %v349_v9 = vmul.f32 %v345_v7, %v333_v6 }
 0x10f   :  { %351 = vst [vmem:[%s614_s3 + $0x8] sm:$0xff] %v347_v8 }
 0x110   :  { %353 = vst [vmem:[%s614_s3 + $0x18] sm:$0xff] %v349_v9 }

// kernel: decoder_forward.10
= control target key start
LH: loop header
LB: loop body
LE: loop exit
PB: predicated region body
PF: predicated region fallthrough
CT: control target
= control target key end

     0   :  { %v319_v1 = vmov 0   ;;  %vm134_vm0 = vcmask 1043456   ;;  %vm130_vm1 = vcmask 588800   ;;  %s412_s1 = inlined_call_operand.vmem [shape: bf16[72,512], index: 1, kind: input, shape index: {}]   ;;  %s413_s2 = inlined_call_operand.vmem [shape: f32[8,1], index: 2, kind: input, shape index: {}]   ;;  %s414_s0 = inlined_call_operand.vmem [shape: bf16[8,72], index: 0, kind: input, shape index: {}]   ;;  %s415_s3 = inlined_call_operand.vmem [shape: f32[8,512], index: 3, kind: output, shape index: {}]  }
   0x1   :  { %v283_v0 = vld [vmem:[%s412_s1 + $0x4] ss:$16 sps:$4 sm:$0xff]   ;;  %179 = vmatprep.mubr.bf16.mxu0 %v319_v1  ;;  %220 = vmatprep.mubr.bf16.mxu1 %v319_v1  ;;  %v285_v2 = vld [vmem:[%s412_s1 + $0xc] ss:$16 sps:$4 sm:$0xff]   ;;  %v287_v3 = vld [vmem:[%s412_s1] ss:$16 sps:$4 sm:$0xff]  }
   0x2   :  { %282 = vset.pattern.permute.xlu0 %v319_v1  ;;  %147 = vmatprep.subr.bf16.mxu0 %v283_v0  ;;  %v288_v4 = vld [vmem:[%s412_s1 + $0x8] ss:$16 sps:$4 sm:$0xff]   ;;  %v289_v5 = vld [vmem:[%s412_s1 + $0x24] ss:$16 sps:$4 sm:$0xff]   ;;  %v291_v6 = vld [vmem:[%s412_s1 + $0x2c] ss:$16 sps:$4 sm:$0xff]  }
   0x3   :  { %188 = vmatprep.subr.bf16.mxu1 %v285_v2  ;;  %148 = vmatpush1.bf16.msra.mxu0 %v287_v3  ;;  %v293_v7 = vld [vmem:[%s412_s1 + $0x20] ss:$16 sps:$4 sm:$0xff]   ;;  %v294_v8 = vld [vmem:[%s412_s1 + $0x28] ss:$16 sps:$4 sm:$0xff]   ;;  %v295_v9 = vld [vmem:[%s412_s1 + $0x44] ss:$16 sps:$4 sm:$0xff]  }
   0x4   :  { %189 = vmatpush1.bf16.msra.mxu1 %v288_v4  ;;  %149 = vmatprep.subr.bf16.mxu0 %v289_v5  ;;  %v297_v10 = vld [vmem:[%s412_s1 + $0x4c] ss:$16 sps:$4 sm:$0xff]   ;;  %v299_v11 = vld [vmem:[%s412_s1 + $0x40] ss:$16 sps:$4 sm:$0xff]   ;;  %v300_v12 = vld [vmem:[%s412_s1 + $0x48] ss:$16 sps:$4 sm:$0xff]  }
   0x5   :  { %190 = vmatprep.subr.bf16.mxu1 %v291_v6  ;;  %v301_v13 = vld [vmem:[%s412_s1 + $0x64] ss:$16 sps:$4 sm:$0xff]   ;;  %v303_v14 = vld [vmem:[%s412_s1 + $0x6c] ss:$16 sps:$4 sm:$0xff]   ;;  %v305_v18 = vld [vmem:[%s412_s1 + $0x60] ss:$16 sps:$4 sm:$0xff]  }
   0x6   :  { %v32_v15 = vld [vmem:[%s412_s1 + $0x80] sm:$0xff]  ;;  %v33_v16 = vld [vmem:[%s412_s1 + $0x88] sm:$0xff] }
   0x7   :  { %150 = vmatpush1.bf16.msra.mxu0 %v293_v7  ;;  %v34_v17 = vld [vmem:[%s413_s2] sm:$0xff]  ;;  %v306_v19 = vld [vmem:[%s412_s1 + $0x68] ss:$16 sps:$4 sm:$0xff]   ;;  %v274_v20 = vcombine.high %v32_v15, %v32_v15  ;;  %v276_v21 = vcombine.high %v33_v16, %v33_v16  ;;  %v273_v22 = vcombine.low %v32_v15, %v32_v15  ;;  %v275_v23 = vcombine.low %v33_v16, %v33_v16 }
   0x8   :  { %191 = vmatpush1.bf16.msra.mxu1 %v294_v8  ;;  %151 = vmatprep.subr.bf16.mxu0 %v295_v9  ;;  %v15_v26 = vld [vmem:[%s414_s0] sm:$0xf] }
   0x9   :  { %192 = vmatprep.subr.bf16.mxu1 %v297_v10  ;;  %37 = vperm.xlu0 %282, %v34_v17   ;;  %v136_v24 = vsel %vm134_vm0, %v273_v22, 0  ;;  %v142_v25 = vsel %vm134_vm0, %v275_v23, 0 }
   0xb   :  { %152 = vmatpush1.bf16.msra.mxu0 %v299_v11 }
   0xc   :  { %193 = vmatpush1.bf16.msra.mxu1 %v300_v12  ;;  %153 = vmatprep.subr.bf16.mxu0 %v301_v13 }
   0xd   :  { %194 = vmatprep.subr.bf16.mxu1 %v303_v14 }
   0xf   :  { %154 = vmatpush1.bf16.msra.mxu0 %v305_v18 }
  0x10   :  { %195 = vmatpush1.bf16.msra.mxu1 %v306_v19  ;;  %277 = vmatprep.subr.msk.bf16.mxu0 %vm134_vm0, %v274_v20 }
  0x11   :  { %279 = vmatprep.subr.msk.bf16.mxu1 %vm134_vm0, %v276_v21 }
  0x13   :  { %156 = vmatpush1.bf16.msra.mxu0 %v136_v24 }
  0x14   :  { %197 = vmatpush1.bf16.msra.mxu1 %v142_v25 }
  0x16   :  { %278 = vmatmul.mubr.msk.bf16.vlgmr.msra.gmra.mrb[0].mxu0 %vm130_vm1, %v15_v26 }
  0x17   :  { %280 = vmatmul.mubr.msk.bf16.vlgmr.msra.gmra.mrb[0].mxu1 %vm130_vm1, %v15_v26 }
  0x88   :  { %v38_v27 = vpop.permute.xlu0 %37 }
  0xe9   :  { %v181_v28 = vpop.f32.mrb[0].mxu0 }
  0xea   :  { %v222_v29 = vpop.f32.mrb[0].mxu1  ;;  %v182_v30 = vadd.f32 %v181_v28, %v38_v27  ;;  %v183_v32 = vpop.f32.mrb[1].mxu0 }
  0xeb   :  { %v223_v31 = vadd.f32 %v222_v29, %v38_v27  ;;  %v224_v33 = vpop.f32.mrb[1].mxu1  ;;  %v184_v34 = vadd.f32 %v183_v32, %v38_v27  ;;  %v185_v36 = vpop.f32.mrb[2].mxu0 }
  0xec   :  { %v225_v35 = vadd.f32 %v224_v33, %v38_v27  ;;  %v226_v37 = vpop.f32.mrb[2].mxu1  ;;  %v233_v38 = vmul.f32 0.70710677, %v182_v30  ;;  %v186_v42 = vpop.f32.mrb[3].mxu0  ;;  %v229_v46 = vmul.f32 0.5, %v182_v30 }
  0xed   :  { %v235_v39 = vmul.f32 0.70710677, %v223_v31  ;;  %v234_v40 = vmul.f32 0.70710677, %v184_v34  ;;  %v227_v43 = vpop.f32.mrb[3].mxu1  ;;  %v231_v49 = vmul.f32 0.5, %v223_v31 }
  0xee   :  { %v236_v41 = vmul.f32 0.70710677, %v225_v35  ;;  %311 = verf.f32 %v233_v38  ;;  %v230_v53 = vmul.f32 0.5, %v184_v34  ;;  %v232_v56 = vmul.f32 0.5, %v225_v35 }
  0xef   :  { %313 = verf.f32 %v235_v39 }
  0xf0   :  { %315 = verf.f32 %v234_v40 }
  0xf1   :  { %317 = verf.f32 %v236_v41 }
  0xf8   :  { %v312_v44 = vpop.eup %311 }
  0xf9   :  { %v314_v45 = vpop.eup %313  ;;  %v241_v47 = vadd.f32 1.0, %v312_v44 }
  0xfa   :  { %v316_v48 = vpop.eup %315  ;;  %v243_v50 = vadd.f32 1.0, %v314_v45 }
  0xfb   :  { %v318_v51 = vpop.eup %317  ;;  %v245_v52 = vmul.f32 %v241_v47, %v229_v46  ;;  %v242_v54 = vadd.f32 1.0, %v316_v48 }
  0xfc   :  { %v247_v55 = vmul.f32 %v243_v50, %v231_v49  ;;  %v244_v57 = vadd.f32 1.0, %v318_v51 }
  0xfd   :  { %249 = vst [vmem:[%s415_s3] sm:$0xff] %v245_v52  ;;  %v246_v58 = vmul.f32 %v242_v54, %v230_v53 }
  0xfe   :  { %251 = vst [vmem:[%s415_s3 + $0x10] sm:$0xff] %v247_v55  ;;  %v248_v59 = vmul.f32 %v244_v57, %v232_v56 }
  0xff   :  { %250 = vst [vmem:[%s415_s3 + $0x8] sm:$0xff] %v246_v58 }
 0x100   :  { %252 = vst [vmem:[%s415_s3 + $0x18] sm:$0xff] %v248_v59 }

// kernel: decoder_forward.11
= control target key start
LH: loop header
LB: loop body
LE: loop exit
PB: predicated region body
PF: predicated region fallthrough
CT: control target
= control target key end

     0   :  { %s663_s12 = smov 0   ;;  %s665_s13 = smov 0   ;;  %s741_s0 = inlined_call_operand.vmem [shape: bf16[3,72], index: 0, kind: input, shape index: {}]   ;;  %s742_s1 = inlined_call_operand.vmem [shape: bf16[72,2048], index: 1, kind: input, shape index: {}]   ;;  %s743_s2 = inlined_call_operand.vmem [shape: f32[3,1], index: 2, kind: input, shape index: {}]   ;;  %s744_s3 = inlined_call_operand.vmem [shape: f32[3,2048], index: 3, kind: output, shape index: {}]  }
   0x1   :  { %s667_s14 = smov 0  }
   0x2 LB: > { %s518_s15 = sadd.s32 4294967295, %s640_s14   ;;  %s680_s16 = sadd.s32 1, %s640_s14   ;;  %s640_s14 = sphi %s667_s14, %s747_s14   ;;  %s636_s13 = sphi %s665_s13, %s746_s13   ;;  %s632_s12 = sphi %s663_s12, %s745_s12  }
   0x3   : > { %s38_s17 = ssub.s32 %s640_s14, %s680_s16  ;;  %s41_s18 = sadd.s32 1, %s636_s13 }
   0x4   : > { %p39_p0 = scmp.eq.s32.totalorder %s38_s17, 0  ;;  %p48_p1 = scmp.ne.s32.totalorder %s636_s13, %s632_s12 }
   0x5   : > { %p49_p2 = scmp.eq.s32.totalorder %s640_s14, 0  ;;  %p521_p4 = scmp.ge.s32.totalorder %s640_s14, 4 }
   0x6   : > { %s689_s19 = scalar_select %p39_p0, %s636_s13, %s41_s18  }
   0x7   : > { %p50_p3 = por %p49_p2, %p48_p1  ;;  %127 = sbr.rel (%p521_p4) target bundleno = 27 (0x1b), region = 24 }
   0xe   : > { %130 = sbr.rel (!%p50_p3) target bundleno = 27 (0x1b), region = 28  ;;  %s132_s20 = sand.u32 (%p50_p3), 1, %s636_s13  }
   0xf   : > { %s553_s21 = sshll.u32 (%p50_p3), %s640_s14, 4  ;;  %s554_s22 = smul.u32 (%p50_p3), 144, %s132_s20 }
  0x10   : > { %s697_s25 = scalar_lea.vmem (%p50_p3), %s742_s1, %s553_s21 }
  0x11   : > { %v150_v0 = vld [vmem:[%s697_s25] sm:$0xff] (%p50_p3)  ;;  %v152_v1 = vld [vmem:[%s697_s25 + $0x8] sm:$0xff] (%p50_p3)  ;;  %s134_s26 = scalar_lea.vmem (%p50_p3), [#allocation2], %s554_s22 }
  0x12   : > { %v154_v2 = vld [vmem:[%s697_s25 + $0x40] sm:$0xff] (%p50_p3)  ;;  %v156_v3 = vld [vmem:[%s697_s25 + $0x48] sm:$0xff] (%p50_p3)  ;;  %151 = vst [vmem:[%s134_s26] sm:$0xff] (%p50_p3), %v150_v0  ;;  %153 = vst [vmem:[%s134_s26 + $0x8] sm:$0xff] (%p50_p3), %v152_v1 }
  0x13   : > { %v158_v4 = vld [vmem:[%s697_s25 + $0x80] sm:$0xff] (%p50_p3)  ;;  %v160_v5 = vld [vmem:[%s697_s25 + $0x88] sm:$0xff] (%p50_p3)  ;;  %155 = vst [vmem:[%s134_s26 + $0x10] sm:$0xff] (%p50_p3), %v154_v2  ;;  %157 = vst [vmem:[%s134_s26 + $0x18] sm:$0xff] (%p50_p3), %v156_v3 }
  0x14   : > { %159 = vst [vmem:[%s134_s26 + $0x20] sm:$0xff] (%p50_p3), %v158_v4  ;;  %161 = vst [vmem:[%s134_s26 + $0x28] sm:$0xff] (%p50_p3), %v160_v5  ;;  %v162_v6 = vld [vmem:[%s697_s25 + $0xc0] sm:$0xff] (%p50_p3)  ;;  %v164_v7 = vld [vmem:[%s697_s25 + $0xc8] sm:$0xff] (%p50_p3) }
  0x15   : > { %v166_v8 = vld [vmem:[%s697_s25 + $0x100] sm:$0xff]  ;;  %163 = vst [vmem:[%s134_s26 + $0x30] sm:$0xff] %v162_v6  ;;  %165 = vst [vmem:[%s134_s26 + $0x38] sm:$0xff] %v164_v7  ;;  %v168_v9 = vld [vmem:[%s697_s25 + $0x108] sm:$0xff] }
  0x16   : > { %167 = vst [vmem:[%s134_s26 + $0x40] sm:$0xff] %v166_v8  ;;  %v170_v10 = vld [vmem:[%s697_s25 + $0x140] sm:$0xff]  ;;  %v172_v11 = vld [vmem:[%s697_s25 + $0x148] sm:$0xff]  ;;  %169 = vst [vmem:[%s134_s26 + $0x48] sm:$0xff] %v168_v9 }
  0x17   : > { %171 = vst [vmem:[%s134_s26 + $0x50] sm:$0xff] %v170_v10  ;;  %173 = vst [vmem:[%s134_s26 + $0x58] sm:$0xff] %v172_v11  ;;  %v174_v12 = vld [vmem:[%s697_s25 + $0x180] sm:$0xff]  ;;  %v176_v13 = vld [vmem:[%s697_s25 + $0x188] sm:$0xff] }
  0x18   : > { %v178_v14 = vld [vmem:[%s697_s25 + $0x1c0] sm:$0xff]  ;;  %175 = vst [vmem:[%s134_s26 + $0x60] sm:$0xff] %v174_v12  ;;  %177 = vst [vmem:[%s134_s26 + $0x68] sm:$0xff] %v176_v13  ;;  %v180_v15 = vld [vmem:[%s697_s25 + $0x1c8] sm:$0xff] }
  0x19   : > { %179 = vst [vmem:[%s134_s26 + $0x70] sm:$0xff] %v178_v14  ;;  %v182_v16 = vld [vmem:[%s697_s25 + $0x200] sm:$0xff]  ;;  %v184_v17 = vld [vmem:[%s697_s25 + $0x208] sm:$0xff]  ;;  %181 = vst [vmem:[%s134_s26 + $0x78] sm:$0xff] %v180_v15 }
  0x1a   : > { %183 = vst [vmem:[%s134_s26 + $0x80] sm:$0xff] %v182_v16  ;;  %185 = vst [vmem:[%s134_s26 + $0x88] sm:$0xff] %v184_v17 }
  0x1b PF: > { %p524_p5 = scmp.ge.s32.totalorder %s640_s14, 1  ;;  %p190_p6 = scmp.lt.s32.totalorder %s640_s14, 5 }
  0x1d   : > { %p191_p7 = pnand %p524_p5, %p190_p6 }
  0x1e   : > { %s197_s27 = sand.u32 (!%p191_p7), 1, %s632_s12   ;;  %v642_v18 = vmov (!%p191_p7), 0   ;;  %v247_v19 = vld [vmem:[%s743_s2] sm:$0x7] (!%p191_p7)  ;;  %vm347_vm0 = vcmask (!%p191_p7), 1043456   ;;  %vm343_vm1 = vcmask (!%p191_p7), 588800  }
  0x1f   : > { %194 = sbr.rel (%p191_p7) target bundleno = 287 (0x11f), region = 51  ;;  %392 = vmatprep.mubr.bf16.mxu0 (!%p191_p7), %v642_v18  ;;  %433 = vmatprep.mubr.bf16.mxu1 (!%p191_p7), %v642_v18  ;;  %v228_v44 = vld [vmem:[%s741_s0] sm:$0x3] (!%p191_p7)  ;;  %s525_s7 = sshll.u32 (!%p191_p7), %s518_s15, 2 }
  0x20   : > { %s555_s28 = smul.u32 (!%p191_p7), 144, %s197_s27  ;;  %581 = vset.pattern.permute.xlu0 (!%p191_p7), %v642_v18  ;;  %p222_p8 = scmp.lt.s32.totalorder (!%p191_p7), %s525_s7, 15 }
  0x21   : > { %250 = vperm.xlu0 (!%p191_p7), %581, %v247_v19  }
  0x22   : > { %s199_s4 = scalar_lea.vmem (!%p191_p7), [#allocation2], %s555_s28 }
  0x23   : > { %v582_v20 = vld [vmem:[%s199_s4 + $0x4] ss:$16 sps:$4 sm:$0xff] (!%p191_p7)   ;;  %v584_v21 = vld [vmem:[%s199_s4 + $0xc] ss:$16 sps:$4 sm:$0xff] (!%p191_p7)   ;;  %v586_v22 = vld [vmem:[%s199_s4] ss:$16 sps:$4 sm:$0xff] (!%p191_p7)  }
  0x24   : > { %360 = vmatprep.subr.bf16.mxu0 (!%p191_p7), %v582_v20  ;;  %v587_v23 = vld [vmem:[%s199_s4 + $0x8] ss:$16 sps:$4 sm:$0xff] (!%p191_p7)   ;;  %401 = vmatprep.subr.bf16.mxu1 (!%p191_p7), %v584_v21  ;;  %v588_v24 = vld [vmem:[%s199_s4 + $0x24] ss:$16 sps:$4 sm:$0xff] (!%p191_p7)   ;;  %v590_v25 = vld [vmem:[%s199_s4 + $0x2c] ss:$16 sps:$4 sm:$0xff] (!%p191_p7)  }
  0x25   : > { %361 = vmatpush1.bf16.msra.mxu0 (!%p191_p7), %v586_v22  ;;  %402 = vmatpush1.bf16.msra.mxu1 (!%p191_p7), %v587_v23  ;;  %v592_v26 = vld [vmem:[%s199_s4 + $0x20] ss:$16 sps:$4 sm:$0xff] (!%p191_p7)   ;;  %v593_v27 = vld [vmem:[%s199_s4 + $0x28] ss:$16 sps:$4 sm:$0xff] (!%p191_p7)   ;;  %v594_v28 = vld [vmem:[%s199_s4 + $0x44] ss:$16 sps:$4 sm:$0xff] (!%p191_p7)  }
  0x26   : > { %362 = vmatprep.subr.bf16.mxu0 %v588_v24  ;;  %403 = vmatprep.subr.bf16.mxu1 %v590_v25  ;;  %v596_v29 = vld [vmem:[%s199_s4 + $0x4c] ss:$16 sps:$4 sm:$0xff]   ;;  %v598_v30 = vld [vmem:[%s199_s4 + $0x40] ss:$16 sps:$4 sm:$0xff]   ;;  %v599_v31 = vld [vmem:[%s199_s4 + $0x48] ss:$16 sps:$4 sm:$0xff]  }
  0x27   : > { %v600_v32 = vld [vmem:[%s199_s4 + $0x64] ss:$16 sps:$4 sm:$0xff]   ;;  %v602_v33 = vld [vmem:[%s199_s4 + $0x6c] ss:$16 sps:$4 sm:$0xff]   ;;  %v604_v36 = vld [vmem:[%s199_s4 + $0x60] ss:$16 sps:$4 sm:$0xff]  }
  0x28   : > { %v245_v34 = vld [vmem:[%s199_s4 + $0x80] sm:$0xff]  ;;  %v246_v35 = vld [vmem:[%s199_s4 + $0x88] sm:$0xff]  ;;  %s749_s7 = smov (!%p222_p8, %s525_s7), 15 }
  0x29   : > { %363 = vmatpush1.bf16.msra.mxu0 %v592_v26  ;;  %404 = vmatpush1.bf16.msra.mxu1 %v593_v27  ;;  %v605_v37 = vld [vmem:[%s199_s4 + $0x68] ss:$16 sps:$4 sm:$0xff]   ;;  %v544_v38 = vcombine.high %v245_v34, %v245_v34  ;;  %v546_v39 = vcombine.high %v246_v35, %v246_v35  ;;  %v543_v40 = vcombine.low %v245_v34, %v245_v34  ;;  %s526_s8 = sshll.u32 %s749_s7, 2 }
  0x2a   : > { %364 = vmatprep.subr.bf16.mxu0 %v594_v28  ;;  %405 = vmatprep.subr.bf16.mxu1 %v596_v29  ;;  %v545_v41 = vcombine.low %v246_v35, %v246_v35  ;;  %s225_s11 = scalar_lea.vmem %s744_s3, %s526_s8 }
  0x2b   : > { %v349_v42 = vsel %vm347_vm0, %v543_v40, 0 }
  0x2c   : > { %v355_v43 = vsel %vm347_vm0, %v545_v41, 0 }
  0x2d   : > { %365 = vmatpush1.bf16.msra.mxu0 %v598_v30  ;;  %406 = vmatpush1.bf16.msra.mxu1 %v599_v31 }
  0x2e   : > { %366 = vmatprep.subr.bf16.mxu0 %v600_v32  ;;  %407 = vmatprep.subr.bf16.mxu1 %v602_v33 }
  0x31   : > { %367 = vmatpush1.bf16.msra.mxu0 %v604_v36  ;;  %408 = vmatpush1.bf16.msra.mxu1 %v605_v37 }
  0x32   : > { %547 = vmatprep.subr.msk.bf16.mxu0 %vm347_vm0, %v544_v38  ;;  %549 = vmatprep.subr.msk.bf16.mxu1 %vm347_vm0, %v546_v39 }
  0x35   : > { %369 = vmatpush1.bf16.msra.mxu0 %v349_v42  ;;  %410 = vmatpush1.bf16.msra.mxu1 %v355_v43 }
  0x38   : > { %548 = vmatmul.mubr.msk.bf16.vlgmr.msra.gmra.mrb[0].mxu0 %vm343_vm1, %v228_v44  ;;  %550 = vmatmul.mubr.msk.bf16.vlgmr.msra.gmra.mrb[0].mxu1 %vm343_vm1, %v228_v44 }
  0xa0   : > { %v251_v45 = vpop.permute.xlu0 %250 }
 0x10b   : > { %v394_v46 = vpop.f32.mrb[0].mxu0  ;;  %v435_v47 = vpop.f32.mrb[0].mxu1 }
 0x10c   : > { %v395_v48 = vadd.f32 %v394_v46, %v251_v45  ;;  %v436_v49 = vadd.f32 %v435_v47, %v251_v45  ;;  %v396_v50 = vpop.f32.mrb[1].mxu0  ;;  %v437_v51 = vpop.f32.mrb[1].mxu1 }
 0x10d   : > { %v397_v52 = vadd.f32 %v396_v50, %v251_v45  ;;  %v438_v53 = vadd.f32 %v437_v51, %v251_v45  ;;  %v398_v54 = vpop.f32.mrb[2].mxu0  ;;  %v439_v55 = vpop.f32.mrb[2].mxu1 }
 0x10e   : > { %610 = vtanh.f32 %v395_v48  ;;  %v399_v56 = vpop.f32.mrb[3].mxu0  ;;  %v440_v57 = vpop.f32.mrb[3].mxu1 }
 0x10f   : > { %612 = vtanh.f32 %v436_v49 }
 0x110   : > { %614 = vtanh.f32 %v397_v52 }
 0x111   : > { %616 = vtanh.f32 %v438_v53 }
 0x118   : > { %v611_v58 = vpop.eup %610 }
 0x119   : > { %v613_v59 = vpop.eup %612 }
 0x11a   : > { %v615_v60 = vpop.eup %614 }
 0x11b   : > { %v617_v61 = vpop.eup %616  ;;  %v450_v62 = vcombine.low %v611_v58, %v615_v60 }
 0x11c   : > { %v451_v63 = vcombine.low %v613_v59, %v617_v61 }
 0x11d   : > { %454 = vst [vmem:[%s225_s11] sm:$0x77] %v450_v62 }
 0x11e   : > { %455 = vst [vmem:[%s225_s11 + $0x8] sm:$0x77] %v451_v63 }
 0x11f PF: > { %p10_p9 = scmp.ge.s32.totalorder %s680_s16, 6   ;;  %s745_s12 = smov %s636_s13 }
 0x120   : > { %s746_s13 = smov %s689_s19  ;;  %s747_s14 = smov %s680_s16 }
 0x121   :  { %12 = sbr.rel (!%p10_p9) target bundleno = 2 (0x2), region = 90 }

</bundles_post_ra>
